<compile_context>
chip_gen: v7x
topology: tpu7x:2x2x1
jax: 0.10.0
libtpu: 0.0.40
codegen_flags: <defaults>
</compile_context>

<pallas_src>
import functools

import jax
import jax.numpy as jnp
from jax.experimental import pallas as pl
from jax.experimental.pallas import tpu as pltpu

_HP = 128  # lane-aligned padded hidden width


def rnn_seq_kernel(pre_h_ref, q_ref, h0_ref, w_step_ref, out_ref, hid_ref):
    """All T RNN steps in a single kernel invocation.

    Per step the only serial work is one (B, 128) @ (128, 128+O) dot:
      fused[:, :128]  -> h @ W1h_h   (recurrence, zero-padded to 128 cols)
      fused[:, 128:]  -> h @ W_fold  (folded o2o contribution)
    plus two adds and a log_softmax.  Everything else was hoisted into
    pre_h / q by the wrapper.
    """
    T = out_ref.shape[0]
    w = w_step_ref[...]                       # (HP, HP + O), VMEM-resident

    def step(t, h):
        fused = jnp.dot(h, w, preferred_element_type=jnp.float32)   # (B, HP+O)
        h_new = pre_h_ref[t] + fused[:, :_HP]                        # (B, HP)
        out2 = q_ref[t] + fused[:, _HP:]                             # (B, O)

        # dropout(p=0.1): identity in eval / inference mode.
        # TODO(synk): training-mode dropout mask via pltpu.prng_seed /
        # pltpu.prng_random_bits is not emitted here.

        # log_softmax(dim=1), numerically stable (no padded columns present).
        m = jnp.max(out2, axis=1, keepdims=True)
        z = out2 - m
        lse = jnp.log(jnp.sum(jnp.exp(z), axis=1, keepdims=True))
        out_ref[t] = z - lse          # VMEM store; HBM writeback once at end
        return h_new

    hid_ref[...] = jax.lax.fori_loop(0, T, step, h0_ref[...], unroll=True)


def _precompute(category, inputs, hidden0, params):
    """Hoist all non-recurrent matmuls out of the kernel (batched over T)."""
    T, B, I = inputs.shape
    C = category.shape[1]
    H = params["w_i2h"].shape[1]
    O = params["w_i2o"].shape[1]

    w1h, b1h = params["w_i2h"], params["b_i2h"]
    w1o, b1o = params["w_i2o"], params["b_i2o"]
    w2, b2 = params["w_o2o"], params["b_o2o"]

    # Row splits of the i2h / i2o weights (category / input / hidden rows).
    w1h_c, w1h_x, w1h_h = w1h[:C], w1h[C:C + I], w1h[C + I:]
    w1o_c, w1o_x, w1o_h = w1o[:C], w1o[C:C + I], w1o[C + I:]
    # Row split of o2o into its hidden-rows / output-rows halves.
    w2_h, w2_o = w2[:H], w2[H:]

    # Time-invariant category terms.
    cat_h = category @ w1h_c + b1h                       # (B, H)
    cat_o = category @ w1o_c + b1o                       # (B, O)

    # Batched input projections for all T steps (one T*B-row matmul each).
    x2 = inputs.reshape(T * B, I)
    pre_h = (x2 @ w1h_x).reshape(T, B, H) + cat_h[None]  # (T, B, H)
    pre_o = (x2 @ w1o_x).reshape(T, B, O) + cat_o[None]  # (T, B, O)

    # Fold o2o:  out2[t] = q[t] + h @ w_fold.
    q = ((pre_h.reshape(T * B, H) @ w2_h +
          pre_o.reshape(T * B, O) @ w2_o).reshape(T, B, O) + b2[None])
    w_fold = w1h_h @ w2_h + w1o_h @ w2_o                 # (H, O)

    # Fused per-step weight, 128-lane-aligned split:
    #   cols [0:H)   = W1h_h, cols [H:128) = 0, cols [128:128+O) = w_fold
    #   rows padded H -> 128 with zeros (padded hidden columns stay zero).
    w_step = jnp.zeros((_HP, _HP + O), jnp.float32)
    w_step = w_step.at[:H, :H].set(w1h_h)
    w_step = w_step.at[:H, _HP:].set(w_fold)

    pre_h_pad = jnp.zeros((T, B, _HP), jnp.float32).at[:, :, :H].set(pre_h)
    h0_pad = jnp.zeros((B, _HP), jnp.float32).at[:, :H].set(hidden0)
    return pre_h_pad, q, h0_pad, w_step


@jax.jit
def rnn_forward_seq(category, inputs, hidden0, params):
    """Run T RNN steps inside a single pallas_call.

    category: (B, n_categories)   -- fixed across steps
    inputs:   (T, B, input_size)  -- per-step inputs
    hidden0:  (B, hidden_size)    -- initial hidden
    returns   (outputs (T, B, output_size), final hidden (B, hidden_size))
    """
    T, B, _ = inputs.shape
    H = params["w_i2h"].shape[1]
    O = params["w_i2o"].shape[1]

    pre_h_pad, q, h0_pad, w_step = _precompute(category, inputs, hidden0, params)

    full = lambda a: pl.BlockSpec(a.shape, lambda i, nd=a.ndim: (0,) * nd)

    out, hid_pad = pl.pallas_call(
        rnn_seq_kernel,
        out_shape=(jax.ShapeDtypeStruct((T, B, O), jnp.float32),
                   jax.ShapeDtypeStruct((B, _HP), jnp.float32)),
        grid=(1,),
        in_specs=[full(pre_h_pad), full(q), full(h0_pad), full(w_step)],
        out_specs=(pl.BlockSpec((T, B, O), lambda i: (0, 0, 0)),
                   pl.BlockSpec((B, _HP), lambda i: (0, 0))),
        compiler_params=pltpu.CompilerParams(
            dimension_semantics=("arbitrary",)),
    )(pre_h_pad, q, h0_pad, w_step)
    return out, hid_pad[:, :H]


def rnn_forward(category, inp, hidden, params):
    """Single-step forward matching the PyTorch module's forward()."""
    out, hid = rnn_forward_seq(category, inp[None], hidden, params)
    return out[0], hid


def init_params(key, n_categories, input_size, hidden_size, output_size):
    """Deterministic init mirroring nn.Linear default (uniform +-1/sqrt(fan_in)).
    Weights stored pre-transposed: (in_features, out_features)."""
    in_i2x = n_categories + input_size + hidden_size
    in_o2o = hidden_size + output_size

    def linear(k, fan_in, fan_out):
        k1, k2 = jax.random.split(k)
        bound = 1.0 / (fan_in ** 0.5)
        w = jax.random.uniform(k1, (fan_in, fan_out), jnp.float32, -bound, bound)
        b = jax.random.uniform(k2, (1, fan_out), jnp.float32, -bound, bound)
        return w, b

    k1, k2, k3 = jax.random.split(key, 3)
    w_i2h, b_i2h = linear(k1, in_i2x, hidden_size)
    w_i2o, b_i2o = linear(k2, in_i2x, output_size)
    w_o2o, b_o2o = linear(k3, in_o2o, output_size)
    return dict(w_i2h=w_i2h, b_i2h=b_i2h,
                w_i2o=w_i2o, b_i2o=b_i2o,
                w_o2o=w_o2o, b_o2o=b_o2o)


def rnn_reference_step(category, x, h, p):
    """Pure-JAX reference matching the PyTorch module exactly (eval mode)."""
    combined = jnp.concatenate([category, x, h], axis=1)
    hidden_new = combined @ p["w_i2h"] + p["b_i2h"]
    out1 = combined @ p["w_i2o"] + p["b_i2o"]
    out2 = jnp.concatenate([hidden_new, out1], axis=1) @ p["w_o2o"] + p["b_o2o"]
    out2 = out2 - jax.scipy.special.logsumexp(out2, axis=1, keepdims=True)
    return out2, hidden_new


if __name__ == "__main__":
    B = 8              # fill all 8 f32 sublanes
    T = 8              # sequence length handled inside one pallas_call
    n_categories = 4
    input_size = 16
    hidden_size = 32
    output_size = 16

    key = jax.random.PRNGKey(0)
    kp, kc, ki = jax.random.split(key, 3)

    params = init_params(kp, n_categories, input_size, hidden_size, output_size)
    category = jax.random.normal(kc, (B, n_categories), jnp.float32)
    inputs = jax.random.normal(ki, (T, B, input_size), jnp.float32)
    hidden0 = jnp.zeros((B, hidden_size), jnp.float32)   # init_hidden()

    # --- single-step forward (matches the PyTorch module's forward) ---------
    out1, hid1 = rnn_forward(category, inputs[0], hidden0, params)
    out1 = jax.block_until_ready(out1)
    hid1 = jax.block_until_ready(hid1)

    ref_out1, ref_hid1 = rnn_reference_step(category, inputs[0], hidden0, params)
    assert jnp.allclose(out1, ref_out1, atol=1e-4, rtol=1e-4)
    assert jnp.allclose(hid1, ref_hid1, atol=1e-4, rtol=1e-4)

    # --- full sequence in one kernel (time loop fully inside the kernel) ----
    outs, hid_final = rnn_forward_seq(category, inputs, hidden0, params)
    outs = jax.block_until_ready(outs)
    hid_final = jax.block_until_ready(hid_final)

    ref_outs = []
    h = hidden0
    for t in range(T):
        o, h = rnn_reference_step(category, inputs[t], h, params)
        ref_outs.append(o)
    ref_outs = jnp.stack(ref_outs, axis=0)

    assert jnp.allclose(outs, ref_outs, atol=1e-4, rtol=1e-4)
    assert jnp.allclose(hid_final, h, atol=1e-4, rtol=1e-4)

    print("KERNEL_OK")
</pallas_src>

<mosaic_0001>
module attributes {stable_mosaic.version = 11 : i64} {
  func.func @rnn_seq_kernel(%arg0: i32, %arg1: memref<1x8x128xf32, #tpu.memory_space<vmem>>, %arg2: memref<1x8x16xf32, #tpu.memory_space<vmem>>, %arg3: memref<8x128xf32, #tpu.memory_space<vmem>>, %arg4: memref<128x144xf32, #tpu.memory_space<vmem>>, %arg5: memref<1x8x16xf32, #tpu.memory_space<vmem>>, %arg6: memref<8x128xf32, #tpu.memory_space<vmem>>) attributes {dimension_semantics = [#tpu.dimension_semantics<arbitrary>], iteration_bounds = array<i64: 1>, scalar_prefetch = 0 : i64, scratch_operands = 0 : i64, tpu.core_type = #tpu.core_type<tc>, window_params = [{pipeline_mode = #tpu.pipeline_mode<synchronous>, transform_indices = @transform_0, window_bounds = array<i64: 1, 8, 128>}, {pipeline_mode = #tpu.pipeline_mode<synchronous>, transform_indices = @transform_1, window_bounds = array<i64: 1, 8, 16>}, {pipeline_mode = #tpu.pipeline_mode<synchronous>, transform_indices = @transform_2, window_bounds = array<i64: 8, 128>}, {pipeline_mode = #tpu.pipeline_mode<synchronous>, transform_indices = @transform_3, window_bounds = array<i64: 128, 144>}, {pipeline_mode = #tpu.pipeline_mode<synchronous>, transform_indices = @transform_4, window_bounds = array<i64: 1, 8, 16>}, {pipeline_mode = #tpu.pipeline_mode<synchronous>, transform_indices = @transform_5, window_bounds = array<i64: 8, 128>}]} {
    %c0 = arith.constant 0 : index
    %c0_0 = arith.constant 0 : index
    %0 = vector.load %arg4[%c0, %c0_0] : memref<128x144xf32, #tpu.memory_space<vmem>>, vector<128x144xf32>
    %c0_1 = arith.constant 0 : index
    %c0_2 = arith.constant 0 : index
    %1 = vector.load %arg3[%c0_1, %c0_2] : memref<8x128xf32, #tpu.memory_space<vmem>>, vector<8x128xf32>
    %c0_i32 = arith.constant 0 : i32
    %cst = arith.constant dense<0.000000e+00> : vector<8x144xf32>
    %2 = tpu.matmul %1, %0, %cst {dimension_numbers = #tpu.dot_dimension_numbers<[1], [0], [0], [1], [0, 0, 1, 1], [], []>} : vector<8x128xf32>, vector<128x144xf32>, vector<8x144xf32> -> vector<8x144xf32>
    %3 = arith.index_cast %c0_i32 : i32 to index
    %c0_3 = arith.constant 0 : index
    %c0_4 = arith.constant 0 : index
    %4 = vector.load %arg1[%3, %c0_3, %c0_4] : memref<1x8x128xf32, #tpu.memory_space<vmem>>, vector<1x8x128xf32>
    %5 = vector.shape_cast %4 : vector<1x8x128xf32> to vector<8x128xf32>
    %6 = vector.extract_strided_slice %2 {offsets = [0, 0], sizes = [8, 128], strides = [1, 1]} : vector<8x144xf32> to vector<8x128xf32>
    %7 = arith.addf %5, %6 : vector<8x128xf32>
    %8 = arith.index_cast %c0_i32 : i32 to index
    %c0_5 = arith.constant 0 : index
    %c0_6 = arith.constant 0 : index
    %9 = vector.load %arg2[%8, %c0_5, %c0_6] : memref<1x8x16xf32, #tpu.memory_space<vmem>>, vector<1x8x16xf32>
    %10 = vector.shape_cast %9 : vector<1x8x16xf32> to vector<8x16xf32>
    %11 = vector.extract_strided_slice %2 {offsets = [0, 128], sizes = [8, 16], strides = [1, 1]} : vector<8x144xf32> to vector<8x16xf32>
    %12 = arith.addf %10, %11 : vector<8x16xf32>
    %cst_7 = arith.constant dense<0xFF800000> : vector<8xf32>
    %13 = vector.multi_reduction <maximumf>, %12, %cst_7 [1] : vector<8x16xf32> to vector<8xf32>
    %14 = vector.shape_cast %13 : vector<8xf32> to vector<8x1xf32>
    %15 = vector.broadcast %14 : vector<8x1xf32> to vector<8x16xf32>
    %16 = arith.subf %12, %15 : vector<8x16xf32>
    %17 = math.exp %16 : vector<8x16xf32>
    %cst_8 = arith.constant dense<0.000000e+00> : vector<8xf32>
    %18 = vector.multi_reduction <add>, %17, %cst_8 [1] : vector<8x16xf32> to vector<8xf32>
    %19 = vector.shape_cast %18 : vector<8xf32> to vector<8x1xf32>
    %20 = math.log %19 : vector<8x1xf32>
    %21 = vector.broadcast %20 : vector<8x1xf32> to vector<8x16xf32>
    %22 = arith.subf %16, %21 : vector<8x16xf32>
    %23 = arith.index_cast %c0_i32 : i32 to index
    %c0_9 = arith.constant 0 : index
    %c0_10 = arith.constant 0 : index
    %24 = vector.load %arg5[%23, %c0_9, %c0_10] : memref<1x8x16xf32, #tpu.memory_space<vmem>>, vector<1x8x16xf32>
    %25 = vector.shape_cast %24 : vector<1x8x16xf32> to vector<8x16xf32>
    %26 = vector.shape_cast %22 : vector<8x16xf32> to vector<1x8x16xf32>
    tpu.vector_store %arg5[%23, %c0_9, %c0_10], %26 {strides = array<i32>} : memref<1x8x16xf32, #tpu.memory_space<vmem>>, vector<1x8x16xf32>,
    %c1_i32 = arith.constant 1 : i32
    %c0_11 = arith.constant 0 : index
    %c0_12 = arith.constant 0 : index
    %27 = vector.load %arg6[%c0_11, %c0_12] : memref<8x128xf32, #tpu.memory_space<vmem>>, vector<8x128xf32>
    tpu.vector_store %arg6[%c0_11, %c0_12], %7 {strides = array<i32>} : memref<8x128xf32, #tpu.memory_space<vmem>>, vector<8x128xf32>,
    return
  }
  func.func @transform_0(%arg0: i32) -> (i32, i32, i32) {
    %c0_i32 = arith.constant 0 : i32
    %c0_i32_0 = arith.constant 0 : i32
    %c0_i32_1 = arith.constant 0 : i32
    %c0_i32_2 = arith.constant 0 : i32
    return %c0_i32, %c0_i32_0, %c0_i32_1 : i32, i32, i32
  }
  func.func @transform_1(%arg0: i32) -> (i32, i32, i32) {
    %c0_i32 = arith.constant 0 : i32
    %c0_i32_0 = arith.constant 0 : i32
    %c0_i32_1 = arith.constant 0 : i32
    %c0_i32_2 = arith.constant 0 : i32
    return %c0_i32, %c0_i32_0, %c0_i32_1 : i32, i32, i32
  }
  func.func @transform_2(%arg0: i32) -> (i32, i32) {
    %c0_i32 = arith.constant 0 : i32
    %c0_i32_0 = arith.constant 0 : i32
    %c0_i32_1 = arith.constant 0 : i32
    return %c0_i32, %c0_i32_0 : i32, i32
  }
  func.func @transform_3(%arg0: i32) -> (i32, i32) {
    %c0_i32 = arith.constant 0 : i32
    %c0_i32_0 = arith.constant 0 : i32
    %c0_i32_1 = arith.constant 0 : i32
    return %c0_i32, %c0_i32_0 : i32, i32
  }
  func.func @transform_4(%arg0: i32) -> (i32, i32, i32) {
    %c0_i32 = arith.constant 0 : i32
    %c0_i32_0 = arith.constant 0 : i32
    %c0_i32_1 = arith.constant 0 : i32
    %c0_i32_2 = arith.constant 0 : i32
    return %c0_i32, %c0_i32_0, %c0_i32_1 : i32, i32, i32
  }
  func.func @transform_5(%arg0: i32) -> (i32, i32) {
    %c0_i32 = arith.constant 0 : i32
    %c0_i32_0 = arith.constant 0 : i32
    %c0_i32_1 = arith.constant 0 : i32
    return %c0_i32, %c0_i32_0 : i32, i32
  }
}

</mosaic_0001>

<bundles_post_ra>
// kernel: rnn_forward_seq.1
= control target key start
LH: loop header
LB: loop body
LE: loop exit
PB: predicated region body
PF: predicated region fallthrough
CT: control target
= control target key end

     0   :  { %11 = vsyncpa [#allocation3], 0  ;;  %v259_v7 = vmov 0.0   ;;  %s424_s0 = inlined_call_operand.vmem [shape: f32[1,8,128], index: 0, kind: input, shape index: {}]   ;;  %s425_s1 = inlined_call_operand.vmem [shape: f32[1,8,16], index: 1, kind: input, shape index: {}]   ;;  %s426_s2 = inlined_call_operand.vmem [shape: f32[8,128], index: 2, kind: input, shape index: {}]   ;;  %s427_s3 = inlined_call_operand.vmem [shape: f32[128,144], index: 3, kind: input, shape index: {}]   ;;  %s428_s4 = inlined_call_operand.hbm [shape: f32[1,8,16], index: 4, kind: output, shape index: {0}]   ;;  %s429_s5 = inlined_call_operand.hbm [shape: f32[8,128], index: 5, kind: output, shape index: {1}]  }
   0x1   :  { %v22_v0 = vld [vmem:[%s427_s3 + $0x8] sm:$0xff]  ;;  %v24_v1 = vld [vmem:[%s427_s3 + $0x18] sm:$0xff]  ;;  %v21_v2 = vld [vmem:[%s427_s3] sm:$0xff]  ;;  %118 = vmatprep.mubr.f32.mxu0 %v259_v7 }
   0x2   :  { %v172_v3 = vpack.c.bf16 %v24_v1, %v22_v0  ;;  %v23_v4 = vld [vmem:[%s427_s3 + $0x10] sm:$0xff]  ;;  %v26_v5 = vld [vmem:[%s427_s3 + $0x28] sm:$0xff]  ;;  %v28_v6 = vld [vmem:[%s427_s3 + $0x38] sm:$0xff] }
   0x3   :  { %v174_v8 = vpack.c.bf16 %v23_v4, %v21_v2  ;;  %v176_v9 = vpack.c.bf16 %v28_v6, %v26_v5  ;;  %v25_v10 = vld [vmem:[%s427_s3 + $0x20] sm:$0xff]  ;;  %v27_v11 = vld [vmem:[%s427_s3 + $0x30] sm:$0xff]  ;;  %v30_v12 = vld [vmem:[%s427_s3 + $0x48] sm:$0xff] }
   0x4   :  { %173 = vmatprep.subr.bf16.mxu0 %v172_v3  ;;  %v32_v13 = vld [vmem:[%s427_s3 + $0x58] sm:$0xff]  ;;  %v178_v14 = vpack.c.bf16 %v27_v11, %v25_v10  ;;  %v29_v16 = vld [vmem:[%s427_s3 + $0x40] sm:$0xff]  ;;  %v31_v17 = vld [vmem:[%s427_s3 + $0x50] sm:$0xff] }
   0x5   :  { %175 = vmatpush1.bf16.msra.mxu0 %v174_v8  ;;  %v180_v15 = vpack.c.bf16 %v32_v13, %v30_v12  ;;  %v34_v18 = vld [vmem:[%s427_s3 + $0x68] sm:$0xff]  ;;  %v36_v19 = vld [vmem:[%s427_s3 + $0x78] sm:$0xff]  ;;  %v182_v20 = vpack.c.bf16 %v31_v17, %v29_v16  ;;  %v33_v22 = vld [vmem:[%s427_s3 + $0x60] sm:$0xff] }
   0x6   :  { %177 = vmatprep.subr.bf16.mxu0 %v176_v9  ;;  %v184_v21 = vpack.c.bf16 %v36_v19, %v34_v18  ;;  %v35_v23 = vld [vmem:[%s427_s3 + $0x70] sm:$0xff]  ;;  %v38_v24 = vld [vmem:[%s427_s3 + $0x88] sm:$0xff]  ;;  %v40_v25 = vld [vmem:[%s427_s3 + $0x98] sm:$0xff] }
   0x9   :  { %179 = vmatpush1.bf16.msra.mxu0 %v178_v14 }
   0xa   :  { %181 = vmatprep.subr.bf16.mxu0 %v180_v15 }
   0xb   :  { %12 = vsyncpa [#allocation5], 0  ;;  %v186_v26 = vpack.c.bf16 %v35_v23, %v33_v22  ;;  %v188_v27 = vpack.c.bf16 %v40_v25, %v38_v24  ;;  %v37_v28 = vld [vmem:[%s427_s3 + $0x80] sm:$0xff]  ;;  %v39_v29 = vld [vmem:[%s427_s3 + $0x90] sm:$0xff]  ;;  %vm129_vm0 = vcmask 130048  }
   0xc   :  { %v42_v30 = vld [vmem:[%s427_s3 + $0xa8] sm:$0xff]  ;;  %v44_v31 = vld [vmem:[%s427_s3 + $0xb8] sm:$0xff]  ;;  %v190_v32 = vpack.c.bf16 %v39_v29, %v37_v28  ;;  %v41_v34 = vld [vmem:[%s427_s3 + $0xa0] sm:$0xff] }
   0xd   :  { %183 = vmatpush1.bf16.msra.mxu0 %v182_v20  ;;  %v192_v33 = vpack.c.bf16 %v44_v31, %v42_v30  ;;  %v43_v35 = vld [vmem:[%s427_s3 + $0xb0] sm:$0xff]  ;;  %v46_v36 = vld [vmem:[%s427_s3 + $0xc8] sm:$0xff]  ;;  %v48_v37 = vld [vmem:[%s427_s3 + $0xd8] sm:$0xff] }
   0xe   :  { %185 = vmatprep.subr.bf16.mxu0 %v184_v21  ;;  %v194_v38 = vpack.c.bf16 %v43_v35, %v41_v34  ;;  %v196_v39 = vpack.c.bf16 %v48_v37, %v46_v36  ;;  %v45_v40 = vld [vmem:[%s427_s3 + $0xc0] sm:$0xff]  ;;  %v47_v41 = vld [vmem:[%s427_s3 + $0xd0] sm:$0xff]  ;;  %v50_v42 = vld [vmem:[%s427_s3 + $0xe8] sm:$0xff] }
   0xf   :  { %v52_v43 = vld [vmem:[%s427_s3 + $0xf8] sm:$0xff]  ;;  %v198_v44 = vpack.c.bf16 %v47_v41, %v45_v40  ;;  %v49_v46 = vld [vmem:[%s427_s3 + $0xe0] sm:$0xff]  ;;  %v51_v47 = vld [vmem:[%s427_s3 + $0xf0] sm:$0xff] }
  0x10   :  { %v200_v45 = vpack.c.bf16 %v52_v43, %v50_v42  ;;  %v202_v48 = vpack.c.bf16 %v51_v47, %v49_v46  ;;  %v53_v49 = vld [vmem:[%s426_s2] sm:$0xff] }
  0x11   :  { %187 = vmatpush1.bf16.msra.mxu0 %v186_v26  ;;  %v125_v50 = vld [vmem:[%s424_s0] sm:$0xff]  ;;  %s260_s0 = smov [#allocation4]  }
  0x12   :  { %189 = vmatprep.subr.bf16.mxu0 %v188_v27  ;;  %v127_v51 = vld [vmem:[%s425_s1] sm:$0xff]  ;;  %s160_s2 = sshll.u32 %s260_s0, 4  ;;  %s161_s2 = int_to_ptr.vmem [resolvable:$true] %s160_s2 }
  0x13   :  { %s211_s1 = scalar_lea.vmem %s161_s2, 128  ;;  %p216_p1 = scmp.lt.s32.totalorder %s161_s2, %s161_s2 }
  0x14   :  { %p212_p0 = scmp.ne.s32.totalorder %s161_s2, %s211_s1  ;;  %p217_p2 = scmp.lt.s32.totalorder %s211_s1, %s211_s1 }
  0x15   :  { %191 = vmatpush1.bf16.msra.mxu0 %v190_v32 }
  0x16   :  { %193 = vmatprep.subr.bf16.mxu0 %v192_v33  ;;  %p218_p3 = por %p217_p2, %p216_p1 }
  0x18   :  { %p219_p4 = pnand %p218_p3, %p212_p0 }
  0x19   :  { %195 = vmatpush1.bf16.msra.mxu0 %v194_v38 }
  0x1a   :  { %197 = vmatprep.subr.bf16.mxu0 %v196_v39 }
  0x1d   :  { %199 = vmatpush1.bf16.msra.mxu0 %v198_v44 }
  0x1e   :  { %201 = vmatprep.subr.bf16.mxu0 %v200_v45 }
  0x21   :  { %203 = vmatpush1.bf16.msra.mxu0 %v202_v48 }
  0x24   :  { %119 = vmatmul.mubr.f32.vlgmr.msra.gmra.mrb[0].mxu0 %v53_v49 }
  0xf7   :  { %v120_v52 = vpop.f32.mrb[0].mxu0 }
  0xf8   :  { %v126_v53 = vadd.f32 %v125_v50, %v120_v52  ;;  %v122_v54 = vpop.f32.mrb[1].mxu0 }
  0xf9   :  { %v128_v55 = vadd.f32 %v127_v51, %v122_v54 }
  0xfa   :  { %143 = vst [vmem:[#allocation4] sm:$0xff] %v126_v53 }
  0xfb   :  { %v130_v56 = vsel %vm129_vm0, %v128_v55, -inf }
  0xfc   :  { %131 = vmax.xlane.f32.xlu0 %v130_v56 }
 0x189   :  { %v132_v57 = vpop.xlane.xlu0 %131 }
 0x18a   :  { %v133_v58 = vsub.f32 %v128_v55, %v132_v57 }
 0x18c   :  { %v134_v59 = vmul.f32 1.442695, %v133_v58 }
 0x18e   :  { %207 = vpow2.f32 %v134_v59 }
 0x198   :  { %v208_v60 = vpop.eup %207 }
 0x199   :  { %v136_v61 = vsel %vm129_vm0, %v208_v60, 0.0 }
 0x19a   :  { %137 = vadd.xlane.f32.xlu0 %v136_v61 }
 0x19b   :  { %222 = shalt.err (!%p219_p4)
}
 0x19c   :  { %s223_s14 = scalar_lea.hbm %s429_s5, 128 }
 0x19d   :  { %p224_p5 = scmp.ne.s32.totalorder %s429_s5, %s223_s14  ;;  %p227_p6 = scmp.lt.u32.totalorder %s223_s14, %s429_s5 }
 0x19f   :  { %p229_p7 = pnand %p227_p6, %p224_p5 }
 0x1a1   :  { %232 = shalt.err (!%p229_p7)
}
 0x1a2   :  { %163 = dma.vmem_to_hbm [thread:$0]  %s161_s2, 128, %s429_s5, [#allocation5]  }
 0x1a3   :  { %s261_s21 = smov [#allocation2]  }
 0x1a4   :  { %s150_s22 = sshll.u32 %s261_s21, 4  ;;  %s151_s22 = int_to_ptr.vmem [resolvable:$true] %s150_s22 }
 0x1a5   :  { %s233_s23 = scalar_lea.vmem %s151_s22, 128  ;;  %p238_p9 = scmp.lt.s32.totalorder %s151_s22, %s151_s22 }
 0x1a6   :  { %p234_p8 = scmp.ne.s32.totalorder %s151_s22, %s233_s23  ;;  %p239_p10 = scmp.lt.s32.totalorder %s233_s23, %s233_s23 }
 0x1a8   :  { %p240_p11 = por %p239_p10, %p238_p9 }
 0x1aa   :  { %p241_p12 = pnand %p240_p11, %p234_p8 }
 0x227   :  { %v138_v62 = vpop.xlane.xlu0 %137 }
 0x228   :  { %209 = vlog2.f32 %v138_v62 }
 0x232   :  { %v210_v63 = vpop.eup %209 }
 0x233   :  { %v140_v0 = vmul.f32 0.6931472, %v210_v63 }
 0x235   :  { %v141_v1 = vsub.f32 %v133_v58, %v140_v0 }
 0x237   :  { %142 = vst.msk [vmem:[#allocation2] sm:$0xff] %vm129_vm0, %v141_v1 }
 0x238   :  { %244 = shalt.err (!%p241_p12)
}
 0x239   :  { %s245_s5 = scalar_lea.hbm %s428_s4, 128 }
 0x23a   :  { %p246_p13 = scmp.ne.s32.totalorder %s428_s4, %s245_s5  ;;  %p249_p0 = scmp.lt.u32.totalorder %s245_s5, %s428_s4 }
 0x23c   :  { %p251_p1 = pnand %p249_p0, %p246_p13 }
 0x23e   :  { %254 = shalt.err (!%p251_p1)
}
 0x23f   :  { %153 = dma.vmem_to_hbm [thread:$0]  %s151_s22, 128, %s428_s4, [#allocation3]  }
 0x240   :  { %255 = dma.done.wait [#allocation3], 128  }
 0x241   :  { %256 = vsyncadd [#allocation3], 4294967168 }
 0x242   :  { %257 = dma.done.wait [#allocation5], 128  }
 0x243   :  { %258 = vsyncadd [#allocation5], 4294967168 }
 0x244   :  { %170 = vsyncpa [#allocation3], 1 }
 0x245   :  { %171 = vsyncpa [#allocation5], 1 }

</bundles_post_ra>
